<compile_context>
chip_gen: v5e
topology: v5e:2x2
jax: 0.10.0
libtpu: 0.0.40
codegen_flags: <defaults>
</compile_context>

<pallas_src>
import functools

import jax
import jax.numpy as jnp
from jax.experimental import pallas as pl
from jax.experimental.pallas import tpu as pltpu

_MiB = 1024 * 1024


# ---------------------------------------------------------------------------
# Kernels
# ---------------------------------------------------------------------------
def _kernel_equal_c(w_ref, x0_ref, x1_ref, out_ref, *, eps):
    # w_ref: (2,) f32 in SMEM.
    # x0_ref, x1_ref: (1, tr, L) VMEM blocks (lane-dense last axis).
    # out_ref: (1, 2, tr, L) block of the output viewed as (B, 2, R, L);
    #   indices 0/1 along axis 1 are the two concat halves.
    w0 = w_ref[0]
    w1 = w_ref[1]
    inv = 1.0 / (w0 + w1 + eps)
    out_ref[0, 0] = (x0_ref[0] * (w0 * inv)).astype(out_ref.dtype)
    out_ref[0, 1] = (x1_ref[0] * (w1 * inv)).astype(out_ref.dtype)


def _kernel_whole(w_ref, x0_ref, x1_ref, out_ref, *, eps):
    # Single-block fast path (grid=()): whole arrays resident in VMEM.
    # x0_ref, x1_ref: (B, R, L); out_ref: (B, 2, R, L).
    w0 = w_ref[0]
    w1 = w_ref[1]
    inv = 1.0 / (w0 + w1 + eps)
    out_ref[:, 0] = (x0_ref[...] * (w0 * inv)).astype(out_ref.dtype)
    out_ref[:, 1] = (x1_ref[...] * (w1 * inv)).astype(out_ref.dtype)


def _kernel_general(w_ref, x0_ref, x1_ref, out_ref, *, c0, eps):
    # General fallback: x0_ref (1, C0, ts); x1_ref (1, C1, ts);
    # out_ref (1, C0+C1, ts). Channel split is done in-kernel; when C0 is a
    # multiple of the sublane packing both stores stay tile-aligned.
    w0 = w_ref[0]
    w1 = w_ref[1]
    inv = 1.0 / (w0 + w1 + eps)
    out_ref[0, :c0] = (x0_ref[0] * (w0 * inv)).astype(out_ref.dtype)
    out_ref[0, c0:] = (x1_ref[0] * (w1 * inv)).astype(out_ref.dtype)


# ---------------------------------------------------------------------------
# Tiling / budgeting helpers
# ---------------------------------------------------------------------------
def _vmem_budgets():
    """Returns (compiler vmem limit, per-step double-buffered byte budget,
    physical VMEM capacity)."""
    try:
        info = pltpu.get_tpu_info()
        cap = int(getattr(info, "vmem_capacity_bytes", 64 * _MiB))
    except Exception:  # query unavailable (e.g. interpret mode)
        cap = 64 * _MiB
    # Keep the pipeline comfortably inside physical VMEM:
    #   v5e/v6e (128 MiB) -> 64 MiB limit;  v7x (64 MiB) -> 32 MiB limit.
    vmem_limit = int(min(cap // 2, 64 * _MiB))
    # Per-step live bytes (both input blocks + output block, x2 buffers).
    # ~1-3 MiB input blocks already reach ~85%+ of HBM roofline; larger only
    # adds VMEM pressure, so cap at 24 MiB.
    step_budget = int(min(vmem_limit // 2, 24 * _MiB))
    return vmem_limit, step_budget, cap


def _aligned_divisor(dim, max_tile, align):
    """Largest divisor of `dim` <= max_tile that is a multiple of `align`
    (None if no such divisor exists)."""
    t = min(max_tile, dim)
    t -= t % align
    while t >= align:
        if dim % t == 0:
            return t
        t -= align
    return None


def _choose_tile(dim, max_tile, align):
    """Tile for one block axis: a divisor of `dim`, multiple of `align`, no
    larger than `max_tile`; falls back to the full extent (always legal for a
    BlockSpec) when no aligned divisor fits the budget."""
    if dim <= max_tile:
        return dim
    t = _aligned_divisor(dim, max_tile, align)
    if t is not None:
        return t
    # No aligned divisor under the budget: smallest aligned divisor at all,
    # else full extent.  Correct; may overshoot the soft byte budget, which
    # the vmem limit is bumped to absorb.
    t = align
    while t < dim:
        if dim % t == 0:
            return t
        t += align
    return dim


def _maybe_even_steps(dim, tile, align):
    """If dim/tile is odd, try a (smaller) aligned divisor giving an even tile
    count so the all-parallel grid splits evenly across v7x's two TensorCores.
    No-op when nothing suitable exists (harmless on single-TC v5e/v6e)."""
    if (dim // tile) % 2 == 0:
        return tile
    t = min(tile, dim // 2)
    t -= t % align
    while t >= align:
        if dim % t == 0 and (dim // t) % 2 == 0:
            return t
        t -= align
    return tile


# ---------------------------------------------------------------------------
# Public entry point
# ---------------------------------------------------------------------------
def bifpn_concat2(w, x0, x1, eps=1e-4):
    """Weighted concat of x0, x1 along the channel axis (NCHW layout)."""
    B, C0, H, W = x0.shape
    B1, C1, H1, W1 = x1.shape
    assert (B, H, W) == (B1, H1, W1), "batch/spatial dims must match for dim=1 concat"
    assert x0.dtype == x1.dtype, "inputs must share a dtype"

    S = H * W
    N = C0 * S                                  # per-batch elements of x0
    itemsize = jnp.dtype(x0.dtype).itemsize
    sublane = max(8, 32 // itemsize)            # 8 f32 / 16 bf16 / 32 int8

    vmem_limit, step_budget, vmem_cap = _vmem_budgets()
    cost = pl.CostEstimate(
        flops=x0.size + x1.size,                            # one multiply / element
        transcendentals=0,
        bytes_accessed=2 * (x0.size + x1.size) * itemsize,  # read + write
    )
    w_spec = pl.BlockSpec(memory_space=pltpu.MemorySpace.SMEM)

    if C0 == C1 and N % 128 == 0:
        # ---- BiFPN case: fold C and H*W into one lane-dense axis ----------
        # x -> (B, R, L); out -> (B, 2, R, L): the concat offset lives in the
        # output index_map and every store is a full, unmasked block.
        L = 128
        for cand in (1024, 512, 256):
            if N % cand == 0:
                L = cand
                break
        R = N // L
        x0f = x0.reshape(B, R, L)
        x1f = x1.reshape(B, R, L)

        # Single-block fast path for tiny inputs: no grid, no pipeline.
        if 4 * B * N * itemsize <= 2 * _MiB:
            limit = int(min(max(vmem_limit, 4 * B * N * itemsize + _MiB), vmem_cap))
            out4 = pl.pallas_call(
                functools.partial(_kernel_whole, eps=eps),
                out_shape=jax.ShapeDtypeStruct((B, 2, R, L), x0.dtype),
                in_specs=[
                    w_spec,
                    pl.BlockSpec((B, R, L), lambda: (0, 0, 0)),
                    pl.BlockSpec((B, R, L), lambda: (0, 0, 0)),
                ],
                out_specs=pl.BlockSpec((B, 2, R, L), lambda: (0, 0, 0, 0)),
                compiler_params=pltpu.CompilerParams(vmem_limit_bytes=limit),
                cost_estimate=cost,
            )(w, x0f, x1f)
            return out4.reshape(B, C0 + C1, H, W)

        # Row tile from the byte budget: per step the live blocks are
        # x0 + x1 + out = 4*tr*L elements; double-buffered -> 8*tr*L*itemsize.
        max_tr = max(sublane, step_budget // (8 * L * itemsize))
        tr = _choose_tile(R, max_tr, sublane)
        if B % 2 == 1:
            tr = _maybe_even_steps(R, tr, sublane)
        n_r = R // tr
        step_bytes = 4 * tr * L * itemsize
        limit = int(min(max(vmem_limit, 2 * step_bytes + _MiB), vmem_cap))

        out4 = pl.pallas_call(
            functools.partial(_kernel_equal_c, eps=eps),
            out_shape=jax.ShapeDtypeStruct((B, 2, R, L), x0.dtype),
            grid=(B, n_r),
            in_specs=[
                w_spec,
                pl.BlockSpec((1, tr, L), lambda b, j: (b, j, 0)),
                pl.BlockSpec((1, tr, L), lambda b, j: (b, j, 0)),
            ],
            out_specs=pl.BlockSpec((1, 2, tr, L), lambda b, j: (b, 0, j, 0)),
            compiler_params=pltpu.CompilerParams(
                dimension_semantics=("parallel", "parallel"),
                vmem_limit_bytes=limit,
            ),
            cost_estimate=cost,
        )(w, x0f, x1f)
        return out4.reshape(B, C0 + C1, H, W)

    # ---- General fallback (C0 != C1, or C*H*W not 128-divisible) -----------
    # (B, C, S) layout, full channels per block, spatial tile sized by the
    # byte budget; the channel split happens in-kernel.
    # TODO(synk): if C0 is not a multiple of the sublane packing, the second
    # store starts mid 8x128 tile (masked stores) - correct but slower.
    x0f = x0.reshape(B, C0, S)
    x1f = x1.reshape(B, C1, S)
    ctot = C0 + C1
    max_ts = max(128, step_budget // (4 * ctot * itemsize))
    ts = _choose_tile(S, max_ts, 128)
    if B % 2 == 1:
        ts = _maybe_even_steps(S, ts, 128)
    n_s = S // ts
    step_bytes = 2 * ctot * ts * itemsize
    limit = int(min(max(vmem_limit, 2 * step_bytes + _MiB), vmem_cap))

    out = pl.pallas_call(
        functools.partial(_kernel_general, c0=C0, eps=eps),
        out_shape=jax.ShapeDtypeStruct((B, ctot, S), x0.dtype),
        grid=(B, n_s),
        in_specs=[
            w_spec,
            pl.BlockSpec((1, C0, ts), lambda b, s: (b, 0, s)),
            pl.BlockSpec((1, C1, ts), lambda b, s: (b, 0, s)),
        ],
        out_specs=pl.BlockSpec((1, ctot, ts), lambda b, s: (b, 0, s)),
        compiler_params=pltpu.CompilerParams(
            dimension_semantics=("parallel", "parallel"),
            vmem_limit_bytes=limit,
        ),
        cost_estimate=cost,
    )(w, x0f, x1f)
    return out.reshape(B, ctot, H, W)


def bifpn_concat2_ref(w, x0, x1, eps=1e-4):
    weight = w / (jnp.sum(w) + eps)
    return jnp.concatenate([weight[0] * x0, weight[1] * x1], axis=1)


if __name__ == "__main__":
    key = jax.random.PRNGKey(0)
    k0, k1, k2, k3, k4, k5 = jax.random.split(key, 6)

    # Parameter init matches nn.Parameter(torch.ones(2)).
    w = jnp.ones((2,), dtype=jnp.float32)

    # Case 1: equal channels, tiny -> single-block fast path.
    B, C, H, W = 2, 4, 16, 16
    x0 = jax.random.normal(k0, (B, C, H, W), dtype=jnp.float32)
    x1 = jax.random.normal(k1, (B, C, H, W), dtype=jnp.float32)
    out = jax.block_until_ready(bifpn_concat2(w, x0, x1))
    ref = bifpn_concat2_ref(w, x0, x1)
    assert out.shape == (B, 2 * C, H, W), out.shape
    assert jnp.allclose(out, ref, atol=1e-6, rtol=1e-6), "mismatch (fast path)"

    # Case 2: equal channels, bigger -> folded lane-dense tiled path.
    B2, C2, H2, W2 = 2, 96, 32, 32
    y0 = jax.random.normal(k2, (B2, C2, H2, W2), dtype=jnp.float32)
    y1 = jax.random.normal(k3, (B2, C2, H2, W2), dtype=jnp.float32)
    out2 = jax.block_until_ready(bifpn_concat2(w, y0, y1))
    ref2 = bifpn_concat2_ref(w, y0, y1)
    assert out2.shape == (B2, 2 * C2, H2, W2), out2.shape
    assert jnp.allclose(out2, ref2, atol=1e-6, rtol=1e-6), "mismatch (tiled path)"

    # Case 3: unequal channel counts -> general fallback path.
    z0 = jax.random.normal(k4, (B, 8, H, W), dtype=jnp.float32)
    z1 = jax.random.normal(k5, (B, 16, H, W), dtype=jnp.float32)
    out3 = jax.block_until_ready(bifpn_concat2(w, z0, z1))
    ref3 = bifpn_concat2_ref(w, z0, z1)
    assert out3.shape == (B, 24, H, W), out3.shape
    assert jnp.allclose(out3, ref3, atol=1e-6, rtol=1e-6), "mismatch (general path)"

    print("KERNEL_OK")
</pallas_src>

<mosaic_0001>
module attributes {stable_mosaic.version = 11 : i64} {
  func.func @_kernel_whole(%arg0: memref<2xf32, #tpu.memory_space<smem>>, %arg1: memref<2x1x1024xf32, #tpu.memory_space<vmem>>, %arg2: memref<2x1x1024xf32, #tpu.memory_space<vmem>>, %arg3: memref<2x2x1x1024xf32, #tpu.memory_space<vmem>>) attributes {dimension_semantics = [], scalar_prefetch = 0 : i64, scratch_operands = 0 : i64, tpu.core_type = #tpu.core_type<tc>} {
    %c0 = arith.constant 0 : index
    %0 = memref.load %arg0[%c0] : memref<2xf32, #tpu.memory_space<smem>>
    %c1 = arith.constant 1 : index
    %1 = memref.load %arg0[%c1] : memref<2xf32, #tpu.memory_space<smem>>
    %2 = arith.addf %0, %1 : f32
    %cst = arith.constant 9.99999974E-5 : f32
    %3 = arith.addf %2, %cst : f32
    %cst_0 = arith.constant 1.000000e+00 : f32
    %4 = arith.divf %cst_0, %3 : f32
    %c0_1 = arith.constant 0 : index
    %c0_2 = arith.constant 0 : index
    %c0_3 = arith.constant 0 : index
    %5 = vector.load %arg1[%c0_1, %c0_2, %c0_3] : memref<2x1x1024xf32, #tpu.memory_space<vmem>>, vector<2x1x1024xf32>
    %6 = arith.mulf %0, %4 : f32
    %7 = vector.broadcast %6 : f32 to vector<2x1x1024xf32>
    %8 = arith.mulf %5, %7 : vector<2x1x1024xf32>
    %c0_4 = arith.constant 0 : index
    %c0_5 = arith.constant 0 : index
    %c0_6 = arith.constant 0 : index
    %c0_7 = arith.constant 0 : index
    %9 = vector.load %arg3[%c0_4, %c0_5, %c0_6, %c0_7] : memref<2x2x1x1024xf32, #tpu.memory_space<vmem>>, vector<2x1x1x1024xf32>
    %10 = vector.shape_cast %9 : vector<2x1x1x1024xf32> to vector<2x1x1024xf32>
    %11 = vector.shape_cast %8 : vector<2x1x1024xf32> to vector<2x1x1x1024xf32>
    tpu.vector_store %arg3[%c0_4, %c0_5, %c0_6, %c0_7], %11 {strides = array<i32>} : memref<2x2x1x1024xf32, #tpu.memory_space<vmem>>, vector<2x1x1x1024xf32>,
    %c0_8 = arith.constant 0 : index
    %c0_9 = arith.constant 0 : index
    %c0_10 = arith.constant 0 : index
    %12 = vector.load %arg2[%c0_8, %c0_9, %c0_10] : memref<2x1x1024xf32, #tpu.memory_space<vmem>>, vector<2x1x1024xf32>
    %13 = arith.mulf %1, %4 : f32
    %14 = vector.broadcast %13 : f32 to vector<2x1x1024xf32>
    %15 = arith.mulf %12, %14 : vector<2x1x1024xf32>
    %c0_11 = arith.constant 0 : index
    %c1_12 = arith.constant 1 : index
    %c0_13 = arith.constant 0 : index
    %c0_14 = arith.constant 0 : index
    %16 = vector.load %arg3[%c0_11, %c1_12, %c0_13, %c0_14] : memref<2x2x1x1024xf32, #tpu.memory_space<vmem>>, vector<2x1x1x1024xf32>
    %17 = vector.shape_cast %16 : vector<2x1x1x1024xf32> to vector<2x1x1024xf32>
    %18 = vector.shape_cast %15 : vector<2x1x1024xf32> to vector<2x1x1x1024xf32>
    tpu.vector_store %arg3[%c0_11, %c1_12, %c0_13, %c0_14], %18 {strides = array<i32>} : memref<2x2x1x1024xf32, #tpu.memory_space<vmem>>, vector<2x1x1x1024xf32>,
    return
  }
}

</mosaic_0001>

<bundles_post_ra>
// kernel: tpu_custom_call.1
= control target key start
LH: loop header
LB: loop body
LE: loop exit
PB: predicated region body
PF: predicated region fallthrough
CT: control target
= control target key end

     0   :  { %8 = vsyncpa [#allocation5], 0  ;;  %s272_s0 = inlined_call_operand.hbm [shape: f32[2], index: 0, kind: input, shape index: {}]   ;;  %s273_s1 = inlined_call_operand.hbm [shape: f32[2,1,1024], index: 1, kind: input, shape index: {}]   ;;  %s274_s2 = inlined_call_operand.hbm [shape: f32[2,1,1024], index: 2, kind: input, shape index: {}]   ;;  %s275_s3 = inlined_call_operand.hbm [shape: f32[2,2,1,1024], index: 3, kind: output, shape index: {}]  }
   0x1   :  { %9 = vsyncpa [#allocation3], 0 }
   0x2   :  { %10 = vsyncpa [#allocation8], 0 }
   0x3   :  { %11 = vsyncpa [#allocation4], 0  ;;  %s17_s14 = sshll.u32 %s272_s0, 4  ;;  %s25_s17 = sshll.u32 %s273_s1, 4  ;;  %s18_s14 = int_to_ptr.hbm [resolvable:$true] %s17_s14  ;;  %s26_s17 = int_to_ptr.hbm [resolvable:$true] %s25_s17 }
   0x4   :  { %s221_s18 = smov [#allocation2]   ;;  %s222_s19 = smov [#allocation6]  }
   0x5   :  { %20 = dma.hbm_to_smem %s18_s14, 16, %s221_s18, [#allocation5]  }
   0x6   :  { %s27_s20 = sshll.u32 %s222_s19, 4  ;;  %s223_s21 = smov 128   ;;  %s28_s20 = int_to_ptr.vmem [resolvable:$true] %s27_s20 }
   0x7   :  { %s224_s22 = smov 8   ;;  %s38_s0 = sshll.u32 %s274_s2, 4  ;;  %s39_s0 = int_to_ptr.hbm [resolvable:$true] %s38_s0 }
   0x8   :  { %33 = dma.hbm_to_vmem [thread:$0]  %s26_s17, 256, %s28_s20, [#allocation3], %s223_s21, %s223_s21, %s224_s22  }
   0x9   :  { %s225_s25 = smov [#allocation7]  }
   0xa   :  { %s40_s26 = sshll.u32 %s225_s25, 4  ;;  %s41_s26 = int_to_ptr.vmem [resolvable:$true] %s40_s26 }
   0xb   :  { %46 = dma.hbm_to_vmem [thread:$0]  %s39_s0, 256, %s41_s26, [#allocation8], %s223_s21, %s223_s21, %s224_s22  }
   0xc   :  { %213 = dma.done.wait [#allocation5], 16  }
   0xd   :  { %214 = vsyncadd [#allocation5], 4294967280 }
   0xe   :  { %215 = dma.done.wait [#allocation3], 256  }
   0xf   :  { %216 = vsyncadd [#allocation3], 4294967040 }
  0x10   :  { %217 = dma.done.wait [#allocation8], 256  }
  0x11   :  { %218 = vsyncadd [#allocation8], 4294967040 }
  0x12   :  { %59 = sfence }
  0x13   :  { %s60_s1 = sld [smem:[#allocation2]]  ;;  %v80_v11 = vld [vmem:[#allocation6] sm:$0xff]  ;;  %v81_v12 = vld [vmem:[#allocation6 + $0x8] sm:$0xff]  ;;  %v88_v13 = vld [vmem:[#allocation7] sm:$0xff]  ;;  %s226_s5 = smov [#allocation9]  }
  0x14   :  { %s262_s27 = sld [smem:[#allocation2 + $0x1]]  ;;  %v89_v14 = vld [vmem:[#allocation7 + $0x8] sm:$0xff]  ;;  %s101_s6 = sshll.u32 %s226_s5, 4  ;;  %s102_s6 = int_to_ptr.vmem [resolvable:$true] %s101_s6 }
  0x15   :  { %s103_s9 = sshll.u32 %s275_s3, 4  ;;  %s104_s9 = int_to_ptr.hbm [resolvable:$true] %s103_s9 }
  0x1a   :  { %s62_s2 = sadd.f32 %s262_s27, %s60_s1 }
  0x1c   :  { %s63_s28 = sadd.f32 0.0001, %s62_s2 }
  0x1e   :  { %v64_v0 = vstv %s63_s28 }
  0x1f   :  { %127 = vrcp.f32 %v64_v0  ;;  %v76_v3 = vand.u32 2147483648, %v64_v0  ;;  %vm70_vm0 = vweird.f32 %v64_v0  ;;  %v74_v5 = vand.u32 2147483647, %v64_v0 }
  0x21   :  { %v77_v7 = vor.u32 1.1754944e-38, %v76_v3  ;;  %vm75_vm3 = vcmp.eq.f32.partialorder %v74_v5, 8.507059e+37 }
  0x25   :  { %v128_v1 = vpop.eup %127 }
  0x26   :  { %v66_v2 = vmul.f32 %v128_v1, %v64_v0  ;;  %vm71_vm1 = vweird.f32 %v128_v1 }
  0x27   :  { %vm72_vm2 = vmor %vm70_vm0, %vm71_vm1 }
  0x28   :  { %v67_v4 = vsub.f32 1.0, %v66_v2 }
  0x2a   :  { %v68_v6 = vmul.f32 %v128_v1, %v67_v4 }
  0x2c   :  { %v69_v8 = vadd.f32 %v128_v1, %v68_v6 }
  0x2e   :  { %v73_v9 = vsel %vm72_vm2, %v128_v1, %v69_v8 }
  0x2f   :  { %v78_v10 = vsel %vm75_vm3, %v77_v7, %v73_v9 }
  0x30   :  { %119 = vpush %v78_v10 }
  0x61   :  { %s120_s29 = spop %119 }
  0x62   :  { %s82_s30 = smul.f32 %s120_s29, %s60_s1 }
  0x63   :  { %s90_s4 = smul.f32 %s120_s29, %s262_s27 }
  0x64   :  { %v83_v15 = vstv %s82_s30 }
  0x65   :  { %v84_v16 = vmul.f32 %v83_v15, %v80_v11  ;;  %v85_v17 = vmul.f32 %v83_v15, %v81_v12  ;;  %v91_v18 = vstv %s90_s4 }
  0x66   :  { %v92_v19 = vmul.f32 %v91_v18, %v88_v13  ;;  %v93_v20 = vmul.f32 %v91_v18, %v89_v14 }
  0x67   :  { %86 = vst [vmem:[#allocation9] sm:$0xff] %v84_v16 }
  0x68   :  { %87 = vst [vmem:[#allocation9 + $0x10] sm:$0xff] %v85_v17 }
  0x69   :  { %95 = vst [vmem:[#allocation9 + $0x8] sm:$0xff] %v92_v19 }
  0x6a   :  { %96 = vst [vmem:[#allocation9 + $0x18] sm:$0xff] %v93_v20 }
  0x6b   :  { %109 = dma.vmem_to_hbm [thread:$0]  %s102_s6, 512, %s104_s9, [#allocation4], %s223_s21, %s223_s21, %s224_s22  }
  0x6c   :  { %219 = dma.done.wait [#allocation4], 512  }
  0x6d   :  { %220 = vsyncadd [#allocation4], 4294966784 }
  0x6e   :  { %114 = vsyncpa [#allocation3], 1 }
  0x6f   :  { %115 = vsyncpa [#allocation8], 1 }
  0x70   :  { %116 = vsyncpa [#allocation4], 1 }
  0x71   :  { %117 = vsyncpa [#allocation5], 1 }

</bundles_post_ra>
